<compile_context>
chip_gen: v6e
topology: v6e:2x2x1
jax: 0.10.0
libtpu: 0.0.40
codegen_flags: <defaults>
</compile_context>

<pallas_src>
import math

import jax
import jax.numpy as jnp
from jax.experimental import pallas as pl
from jax.experimental.pallas import tpu as pltpu

_LANE = 128


# ----------------------------------------------------------------------------
# Kernel body (shared by every layout): in-kernel dtype promotion + multiply.
# ----------------------------------------------------------------------------
def _cmul_kernel(x_ref, w_ref, o_ref):
    o_ref[...] = x_ref[...].astype(o_ref.dtype) * w_ref[...].astype(o_ref.dtype)


# ----------------------------------------------------------------------------
# Helpers
# ----------------------------------------------------------------------------
def _sublane_multiple(dtypes) -> int:
    """Row-tiling granularity: sub-32-bit dtypes pack along sublanes."""
    m = 8
    for dt in dtypes:
        m = max(m, 32 // max(1, jnp.dtype(dt).itemsize))
    return m


def _round_block(t: int, full: int, unit: int) -> int:
    """Largest legal block extent derived from t: either `full` or a multiple of `unit`."""
    if t >= full:
        return full
    return min(full, max(unit, (t // unit) * unit))


def _vmem_config():
    """(pipeline block budget bytes, vmem_limit_bytes), tuned per TPU generation."""
    physical = 0
    try:
        physical = int(pltpu.get_tpu_info().vmem_capacity_bytes)
    except Exception:
        physical = 0
    if physical and physical <= (64 << 20):
        # v7x-class: 64 MiB physical per TensorCore, 32 MiB scoped default.
        return 20 << 20, 32 << 20
    if physical >= (128 << 20):
        # v5e / v6e: 128 MiB physical; raise the scoped limit explicitly.
        return 24 << 20, 34 << 20
    # Unknown chip: stay conservative.
    return 16 << 20, 32 << 20


# ----------------------------------------------------------------------------
# Layout 1: "tail match" — x viewed as (B, D), w as (1, D) (or a scalar).
# ----------------------------------------------------------------------------
def _cmul_tail(x, wt, B, D, out_dtype, donate_x, budget, vmem_limit):
    scalar_w = wt.size == 1
    ix = jnp.dtype(x.dtype).itemsize
    iw = jnp.dtype(wt.dtype).itemsize
    io = jnp.dtype(out_dtype).itemsize
    sub = _sublane_multiple((x.dtype, wt.dtype, out_dtype))
    w_b = 0 if scalar_w else iw

    x2 = x.reshape(B, D)
    w2 = wt.reshape(1, 1) if scalar_w else wt.reshape(1, D)

    total_bytes = B * D * (ix + io) + (0 if scalar_w else D * iw)
    per_buf = max(1, budget // 2)  # pipeline is double-buffered

    def step_bytes(tb, td):
        return td * (tb * (ix + io) + w_b)

    if total_bytes <= (512 << 10):
        # Tiny problem: one block, one DMA each way, zero per-step overhead.
        TB, TD = B, D
    else:
        if step_bytes(min(B, sub), D) <= per_buf:
            # Full-width rows per step (fully contiguous DMA); tile batch only.
            TD = D
            tb_fit = (per_buf // D - w_b) // (ix + io)
            TB = _round_block(tb_fit, B, sub)
        else:
            # Feature dim too large for even a few full rows: tile it in
            # 128-lane multiples as well.
            TB = min(B, sub)
            td_fit = per_buf // max(1, TB * (ix + io) + w_b)
            TD = _round_block(td_fit, D, _LANE)
            if step_bytes(TB, TD) > per_buf:
                TB = 1
                TD = _round_block(per_buf // max(1, (ix + io) + w_b), D, _LANE)

        # Guarantee >=4 grid steps so in/out DMA overlaps compute and both v7x
        # TensorCores get work.
        def steps(tb, td):
            return pl.cdiv(B, tb) * pl.cdiv(D, td)

        while steps(TB, TD) < 4:
            new_tb = _round_block(TB // 2, B, sub) if TB > 1 else TB
            if new_tb < TB:
                TB = new_tb
                continue
            new_td = _round_block(TD // 2, D, _LANE) if TD > 1 else TD
            if new_td < TD:
                TD = new_td
                continue
            break

    grid = (pl.cdiv(D, TD), pl.cdiv(B, TB))  # feature outer, batch inner

    if scalar_w:
        w_spec = pl.BlockSpec((1, 1), lambda d, b: (0, 0))
    else:
        # Block index is constant across the inner batch steps, so Pallas
        # elides the weight re-DMA.
        w_spec = pl.BlockSpec((1, TD), lambda d, b: (0, d))

    extra = {}
    if donate_x and x2.dtype == out_dtype:
        extra["input_output_aliases"] = {0: 0}

    return pl.pallas_call(
        _cmul_kernel,
        out_shape=jax.ShapeDtypeStruct((B, D), out_dtype),
        grid=grid,
        in_specs=[pl.BlockSpec((TB, TD), lambda d, b: (b, d)), w_spec],
        out_specs=pl.BlockSpec((TB, TD), lambda d, b: (b, d)),
        compiler_params=pltpu.CompilerParams(
            dimension_semantics=("parallel", "parallel"),
            vmem_limit_bytes=vmem_limit,
        ),
        **extra,
    )(x2, w2)


# ----------------------------------------------------------------------------
# Layout 2: "middle match" (per-channel scale) — x (B, C, L), w (1, C, 1).
# ----------------------------------------------------------------------------
def _cmul_middle(x, wv, B, C, L, out_dtype, donate_x, budget, vmem_limit):
    ix = jnp.dtype(x.dtype).itemsize
    iw = jnp.dtype(wv.dtype).itemsize
    io = jnp.dtype(out_dtype).itemsize
    sub = _sublane_multiple((x.dtype, wv.dtype, out_dtype))

    x3 = x.reshape(B, C, L)
    w3 = wv.reshape(1, C, 1)

    total_bytes = B * C * L * (ix + io) + C * iw
    per_buf = max(1, budget // 2)

    def step_bytes(tb, tc, tl):
        return tb * tc * tl * (ix + io) + tc * iw

    if total_bytes <= (512 << 10):
        TB, TC, TL = B, C, L
    else:
        TL, TC = L, C
        if step_bytes(1, C, L) <= per_buf:
            TB = min(B, max(1, (per_buf - C * iw) // max(1, C * L * (ix + io))))
        else:
            TB = 1
            # Shrink the lane axis first (keeps the whole channel vector resident).
            if L % _LANE == 0 and L > _LANE:
                tl_fit = max(1, (per_buf - C * iw) // max(1, C * (ix + io)))
                TL = _round_block(tl_fit, L, _LANE)
            if step_bytes(1, C, TL) > per_buf:
                # Tile channels too; the weight block is tiled along C with x.
                tc_fit = max(1, per_buf // max(1, TL * (ix + io) + iw))
                TC = _round_block(tc_fit, C, sub)
            if step_bytes(1, TC, TL) > per_buf:
                return None  # caller falls back to the tail path

        def steps(tb, tc, tl):
            return pl.cdiv(B, tb) * pl.cdiv(C, tc) * pl.cdiv(L, tl)

        while steps(TB, TC, TL) < 4:
            if TB > 1:
                TB = max(1, TB // 2)
                continue
            if L % _LANE == 0:
                new_tl = _round_block(TL // 2, L, _LANE)
                if new_tl < TL:
                    TL = new_tl
                    continue
            new_tc = _round_block(TC // 2, C, sub)
            if new_tc < TC:
                TC = new_tc
                continue
            break

    grid = (pl.cdiv(C, TC), pl.cdiv(L, TL), pl.cdiv(B, TB))  # channel outer, batch inner

    extra = {}
    if donate_x and x3.dtype == out_dtype:
        extra["input_output_aliases"] = {0: 0}

    return pl.pallas_call(
        _cmul_kernel,
        out_shape=jax.ShapeDtypeStruct((B, C, L), out_dtype),
        grid=grid,
        in_specs=[
            pl.BlockSpec((TB, TC, TL), lambda c, l, b: (b, c, l)),
            # Tiny (1, TC, 1) weight block: index constant across l and b steps,
            # so it is only re-fetched when the channel block changes.
            pl.BlockSpec((1, TC, 1), lambda c, l, b: (0, c, 0)),
        ],
        out_specs=pl.BlockSpec((TB, TC, TL), lambda c, l, b: (b, c, l)),
        compiler_params=pltpu.CompilerParams(
            dimension_semantics=("parallel", "parallel", "parallel"),
            vmem_limit_bytes=vmem_limit,
        ),
        **extra,
    )(x3, w3)


# ----------------------------------------------------------------------------
# Public wrapper: output = x * w with standard broadcasting (Cmul.forward).
# ----------------------------------------------------------------------------
def cmul(x: jax.Array, w: jax.Array, *, donate_x: bool = False) -> jax.Array:
    x = jnp.asarray(x)
    w = jnp.asarray(w)
    out_shape = jnp.broadcast_shapes(x.shape, w.shape)
    out_dtype = jnp.result_type(x.dtype, w.dtype)

    if math.prod(out_shape) == 0:
        return jnp.zeros(out_shape, out_dtype)
    if len(out_shape) == 0:
        return (x * w).astype(out_dtype)  # 0-d: nothing to tile

    # Rare: broadcasting expands x's shape (e.g. w.ndim > x.ndim).
    if x.shape != out_shape:
        x = jnp.broadcast_to(x, out_shape)

    nd = len(out_shape)
    w_shape = (1,) * (nd - w.ndim) + tuple(w.shape)
    wv = w.reshape(w_shape)

    budget, vmem_limit = _vmem_config()

    # Leading axes over which w broadcasts (batch-like): never replicate w there.
    k1 = 0
    while k1 < nd and w_shape[k1] == 1:
        k1 += 1

    if k1 == nd:
        # Scalar weight: pick a lane-dense split of x freely.
        total = math.prod(out_shape)
        if total % _LANE == 0:
            B, D = total // _LANE, _LANE
        else:
            B, D = math.prod(out_shape[:-1]), out_shape[-1]
        out = _cmul_tail(x, wv, B, D, out_dtype, donate_x, budget, vmem_limit)
        return out.reshape(out_shape)

    k2 = k1
    while k2 < nd and w_shape[k2] == out_shape[k2]:
        k2 += 1
    trailing_ones = all(d == 1 for d in w_shape[k2:])
    B = math.prod(out_shape[:k1]) if k1 > 0 else 1

    if trailing_ones and k2 == nd:
        # w matches every trailing feature dim: x (B, D) * w (1, D).
        D = math.prod(out_shape[k1:])
        out = _cmul_tail(x, wv, B, D, out_dtype, donate_x, budget, vmem_limit)
        return out.reshape(out_shape)

    if trailing_ones:
        # Per-channel-style weight, e.g. Cmul(1, C, 1, 1): x (B, C, L) * w (1, C, 1).
        C = math.prod(out_shape[k1:k2])
        L = math.prod(out_shape[k2:])
        out = _cmul_middle(x, wv, B, C, L, out_dtype, donate_x, budget, vmem_limit)
        if out is not None:
            return out.reshape(out_shape)

    # Generic fallback: replicate w over the trailing feature dims only (never
    # over the leading broadcast/batch dims), turning it into a tail match.
    # TODO(synk): interleaved broadcast patterns could avoid this replication
    # with a rank-preserving kernel layout.
    wt = jnp.broadcast_to(wv, (1,) * k1 + out_shape[k1:])
    D = math.prod(out_shape[k1:])
    out = _cmul_tail(x, wt, B, D, out_dtype, donate_x, budget, vmem_limit)
    return out.reshape(out_shape)


# ----------------------------------------------------------------------------
# Self-test
# ----------------------------------------------------------------------------
if __name__ == "__main__":
    key = jax.random.PRNGKey(0)
    kx, kw, kx2, kw2, kx3 = jax.random.split(key, 5)

    # Cmul(1, C, H, W) on an NCHW activation (tail-match path, single block).
    N, C, H, W = 2, 4, 16, 16
    size = (1, C, H, W)
    x = jax.random.normal(kx, (N, C, H, W), dtype=jnp.float32)
    stdv = 1.0 / math.sqrt(math.prod(size))  # Cmul.reset() default init
    w = jax.random.uniform(kw, size, dtype=jnp.float32, minval=-stdv, maxval=stdv)
    out = cmul(x, w)
    jax.block_until_ready(out)
    ref = x * w
    assert out.shape == ref.shape and out.dtype == ref.dtype
    assert jnp.allclose(out, ref, rtol=1e-6, atol=1e-6)

    # Cmul(1, C, 1, 1): per-channel scale on non-lane-aligned spatial dims
    # (middle-match path; the weight is never materialised to x's shape).
    x2 = jax.random.normal(kx2, (2, 3, 5, 7), dtype=jnp.float32)
    w2 = jax.random.uniform(kw2, (1, 3, 1, 1), dtype=jnp.float32, minval=-1.0, maxval=1.0)
    out2 = cmul(x2, w2)
    jax.block_until_ready(out2)
    assert jnp.allclose(out2, x2 * w2, rtol=1e-6, atol=1e-6)

    # Mixed dtypes (in-kernel promotion) + a multi-step tiled grid.
    x3 = jax.random.normal(kx3, (16, 8, 64, 128), dtype=jnp.bfloat16)
    w3 = jax.random.uniform(kw, (1, 8, 64, 128), dtype=jnp.float32, minval=-0.5, maxval=0.5)
    out3 = cmul(x3, w3)
    jax.block_until_ready(out3)
    ref3 = x3.astype(jnp.float32) * w3
    assert out3.dtype == jnp.float32
    assert jnp.allclose(out3, ref3, rtol=1e-5, atol=1e-5)

    print("KERNEL_OK")
</pallas_src>

<mosaic_0001>
module attributes {stable_mosaic.version = 11 : i64} {
  func.func @_cmul_kernel(%arg0: i32, %arg1: i32, %arg2: memref<2x1024xf32, #tpu.memory_space<vmem>>, %arg3: memref<1x1024xf32, #tpu.memory_space<vmem>>, %arg4: memref<2x1024xf32, #tpu.memory_space<vmem>>) attributes {dimension_semantics = [#tpu.dimension_semantics<parallel>, #tpu.dimension_semantics<parallel>], iteration_bounds = array<i64: 1, 1>, scalar_prefetch = 0 : i64, scratch_operands = 0 : i64, tpu.core_type = #tpu.core_type<tc>, window_params = [{transform_indices = @transform_0, window_bounds = array<i64: 2, 1024>}, {transform_indices = @transform_1, window_bounds = array<i64: 1, 1024>}, {transform_indices = @transform_2, window_bounds = array<i64: 2, 1024>}]} {
    %c0 = arith.constant 0 : index
    %c0_0 = arith.constant 0 : index
    %0 = vector.load %arg2[%c0, %c0_0] : memref<2x1024xf32, #tpu.memory_space<vmem>>, vector<2x1024xf32>
    %c0_1 = arith.constant 0 : index
    %c0_2 = arith.constant 0 : index
    %1 = vector.load %arg3[%c0_1, %c0_2] : memref<1x1024xf32, #tpu.memory_space<vmem>>, vector<1x1024xf32>
    %2 = vector.broadcast %1 : vector<1x1024xf32> to vector<2x1024xf32>
    %3 = arith.mulf %0, %2 : vector<2x1024xf32>
    %c0_3 = arith.constant 0 : index
    %c0_4 = arith.constant 0 : index
    %4 = vector.load %arg4[%c0_3, %c0_4] : memref<2x1024xf32, #tpu.memory_space<vmem>>, vector<2x1024xf32>
    tpu.vector_store %arg4[%c0_3, %c0_4], %3 {strides = array<i32>} : memref<2x1024xf32, #tpu.memory_space<vmem>>, vector<2x1024xf32>,
    return
  }
  func.func @transform_0(%arg0: i32, %arg1: i32) -> (i32, i32) {
    %c0_i32 = arith.constant 0 : i32
    return %arg1, %arg0 : i32, i32
  }
  func.func @transform_1(%arg0: i32, %arg1: i32) -> (i32, i32) {
    %c0_i32 = arith.constant 0 : i32
    %c0_i32_0 = arith.constant 0 : i32
    return %c0_i32, %arg0 : i32, i32
  }
  func.func @transform_2(%arg0: i32, %arg1: i32) -> (i32, i32) {
    %c0_i32 = arith.constant 0 : i32
    return %arg1, %arg0 : i32, i32
  }
}

</mosaic_0001>

<bundles_post_ra>
// kernel: tpu_custom_call.1
= control target key start
LH: loop header
LB: loop body
LE: loop exit
PB: predicated region body
PF: predicated region fallthrough
CT: control target
= control target key end

     0   :  { %7 = vsyncpa [#allocation3], 0  ;;  %s226_s0 = inlined_call_operand.hbm [shape: f32[2,1024], index: 0, kind: input, shape index: {}]   ;;  %s227_s1 = inlined_call_operand.hbm [shape: f32[1,1024], index: 1, kind: input, shape index: {}]   ;;  %s228_s2 = inlined_call_operand.hbm [shape: f32[2,1024], index: 2, kind: output, shape index: {}]  }
   0x1   :  { %8 = vsyncpa [#allocation6], 0 }
   0x2   :  { %9 = vsyncpa [#allocation4], 0  ;;  %s198_s9 = smov [#allocation2]   ;;  %s199_s11 = smov [#allocation5]  }
   0x3   :  { %s16_s10 = sshll.u32 %s198_s9, 4  ;;  %s26_s12 = sshll.u32 %s199_s11, 4  ;;  %s17_s10 = int_to_ptr.vmem [resolvable:$true] %s16_s10  ;;  %s27_s12 = int_to_ptr.vmem [resolvable:$true] %s26_s12 }
   0x4   :  { %s140_s13 = scalar_lea.vmem %s17_s10, 256  ;;  %p145_p1 = scmp.lt.s32.totalorder %s17_s10, %s17_s10 }
   0x5   :  { %p141_p0 = scmp.ne.s32.totalorder %s17_s10, %s140_s13  ;;  %p146_p2 = scmp.lt.s32.totalorder %s140_s13, %s140_s13 }
   0x7   :  { %p147_p3 = por %p146_p2, %p145_p1 }
   0x9   :  { %p148_p4 = pnand %p147_p3, %p141_p0 }
   0xb   :  { %151 = shalt.err (!%p148_p4)
}
   0xc   :  { %19 = dma.hbm_to_vmem [thread:$0]  %s226_s0, 256, %s17_s10, [#allocation3]  }
   0xd   :  { %s160_s16 = scalar_lea.vmem %s27_s12, 128  ;;  %p165_p6 = scmp.lt.s32.totalorder %s27_s12, %s27_s12 }
   0xe   :  { %p161_p5 = scmp.ne.s32.totalorder %s27_s12, %s160_s16  ;;  %p166_p7 = scmp.lt.s32.totalorder %s160_s16, %s160_s16 }
  0x10   :  { %p167_p8 = por %p166_p7, %p165_p6 }
  0x12   :  { %p168_p9 = pnand %p167_p8, %p161_p5 }
  0x14   :  { %171 = shalt.err (!%p168_p9)
}
  0x15   :  { %29 = dma.hbm_to_vmem [thread:$0]  %s227_s1, 128, %s27_s12, [#allocation6]  }
  0x16   :  { %192 = dma.done.wait [#allocation3], 256  }
  0x17   :  { %193 = vsyncadd [#allocation3], 4294967040 }
  0x18   :  { %194 = dma.done.wait [#allocation6], 128  }
  0x19   :  { %195 = vsyncadd [#allocation6], 4294967168  ;;  %v40_v0 = vlaneseq  ;;  %v200_v1 = vmov 1983009808   ;;  %v38_v13 = vld [vmem:[#allocation5] sm:$0xff]  ;;  %v36_v29 = vld [vmem:[#allocation2] sm:$0xff] }
  0x1a   :  { %v75_v2 = vunpack.c.l.s4 %v200_v1  ;;  %v37_v33 = vld [vmem:[#allocation2 + $0x8] sm:$0xff]  ;;  %s201_s0 = smov [#allocation7]  }
  0x1b   :  { %v41_v3 = vshrl.u32 %v40_v0, 7  ;;  %s118_s1 = sshll.u32 %s201_s0, 4  ;;  %s119_s1 = int_to_ptr.vmem [resolvable:$true] %s118_s1 }
  0x1c   :  { %v76_v4 = vunpack.c.0.s8 %v75_v2  ;;  %s172_s19 = scalar_lea.vmem %s119_s1, 256  ;;  %p177_p11 = scmp.lt.s32.totalorder %s119_s1, %s119_s1 }
  0x1d   :  { %v42_v5 = vsub.s32 0, %v41_v3  ;;  %v46_v6 = vsub.s32 1, %v41_v3  ;;  %v50_v7 = vsub.s32 2, %v41_v3  ;;  %v54_v8 = vsub.s32 3, %v41_v3  ;;  %p173_p10 = scmp.ne.s32.totalorder %s119_s1, %s172_s19  ;;  %p178_p12 = scmp.lt.s32.totalorder %s172_s19, %s172_s19 }
  0x1e   :  { %v58_v9 = vsub.s32 4, %v41_v3  ;;  %v62_v10 = vsub.s32 5, %v41_v3  ;;  %v66_v11 = vsub.s32 6, %v41_v3  ;;  %v70_v12 = vsub.s32 7, %v41_v3 }
  0x1f   :  { %v79_v14 = vsub.s32 %v76_v4, %v41_v3  ;;  %v43_v15 = vrot.slane %v38_v13, %v42_v5  ;;  %v47_v16 = vrot.slane %v38_v13, %v46_v6  ;;  %v51_v17 = vrot.slane %v38_v13, %v50_v7  ;;  %p179_p13 = por %p178_p12, %p177_p11 }
  0x20   :  { %v55_v18 = vrot.slane %v38_v13, %v54_v8  ;;  %v59_v19 = vrot.slane %v38_v13, %v58_v9  ;;  %v63_v20 = vrot.slane %v38_v13, %v62_v10  ;;  %v67_v21 = vrot.slane %v38_v13, %v66_v11 }
  0x21   :  { %v71_v22 = vrot.slane %v38_v13, %v70_v12  ;;  %v72_v23 = vcombine.low %v43_v15, %v47_v16  ;;  %p180_p0 = pnand %p179_p13, %p173_p10 }
  0x22   :  { %v73_v24 = vcombine.low %v51_v17, %v55_v18  ;;  %v89_v25 = vcombine.low %v59_v19, %v63_v20 }
  0x23   :  { %v90_v26 = vcombine.low %v67_v21, %v71_v22  ;;  %v80_v27 = vrot.slane %v72_v23, %v79_v14 }
  0x24   :  { %v87_v28 = vrot.slane %v73_v24, %v79_v14  ;;  %v97_v30 = vrot.slane %v89_v25, %v79_v14 }
  0x25   :  { %v104_v31 = vrot.slane %v90_v26, %v79_v14 }
  0x26   :  { %v88_v32 = vcombine.low %v80_v27, %v87_v28 }
  0x27   :  { %v105_v34 = vcombine.low %v97_v30, %v104_v31 }
  0x28   :  { %v108_v35 = vmul.f32 %v88_v32, %v36_v29 }
  0x29   :  { %v109_v36 = vmul.f32 %v105_v34, %v37_v33 }
  0x2a   :  { %110 = vst [vmem:[#allocation7] sm:$0xff] %v108_v35 }
  0x2b   :  { %111 = vst [vmem:[#allocation7 + $0x8] sm:$0xff] %v109_v36 }
  0x2c   :  { %183 = shalt.err (!%p180_p0)
}
  0x2d   :  { %121 = dma.vmem_to_hbm [thread:$0]  %s119_s1, 256, %s228_s2, [#allocation4]  }
  0x2e   :  { %196 = dma.done.wait [#allocation4], 256  }
  0x2f   :  { %197 = vsyncadd [#allocation4], 4294967040 }
  0x30   :  { %125 = vsyncpa [#allocation3], 1 }
  0x31   :  { %126 = vsyncpa [#allocation6], 1 }
  0x32   :  { %127 = vsyncpa [#allocation4], 1 }

</bundles_post_ra>
